<compile_context>
chip_gen: v7x
topology: tpu7x:2x2x1
jax: 0.10.0
libtpu: 0.0.40
codegen_flags: <defaults>
</compile_context>

<pallas_src>
import jax
import jax.numpy as jnp
from jax import lax
from jax.experimental import pallas as pl
from jax.experimental.pallas import tpu as pltpu

LN_EPS = 1e-12


def bert_output_kernel(h_ref, x_ref, w_ref, b_ref, g_ref, beta_ref, o_ref):
    # h_ref: (TM, I)  x_ref: (TM, H)  w_ref: (I, H) bf16  b/g/beta: (1, H)  o_ref: (TM, H)
    # dense: hidden_states @ W^T + b.  bf16 MXU operands, f32 accumulation.
    y = jnp.dot(h_ref[...].astype(jnp.bfloat16), w_ref[...],
                preferred_element_type=jnp.float32)
    y = y + b_ref[...].astype(jnp.float32)

    # TODO(synk): dropout is identity in eval mode (hidden_dropout_prob is train-only).
    y = y + x_ref[...].astype(jnp.float32)          # residual add

    # LayerNorm over H (eps=1e-12, biased variance). Fused moments: reduce sum(y) and
    # sum(y*y) over the same f32 tile; var = E[y^2] - mean^2 (no separate centering pass).
    inv_h = jnp.float32(1.0 / y.shape[-1])
    mean = jnp.sum(y, axis=-1, keepdims=True) * inv_h
    mean_sq = jnp.sum(y * y, axis=-1, keepdims=True) * inv_h
    var = jnp.maximum(mean_sq - mean * mean, 0.0)    # clamp tiny negative cancellation
    inv_std = lax.rsqrt(var + LN_EPS)                # EUP slot (free vs. VPU)
    out = (y - mean) * inv_std
    out = out * g_ref[...].astype(jnp.float32) + beta_ref[...].astype(jnp.float32)

    o_ref[...] = out.astype(o_ref.dtype)


def _choose_tm(M, tm):
    tm = min(tm, M)
    if tm == M:
        return tm                       # full-extent block is always legal
    if tm >= 256:
        return (tm // 256) * 256        # full MXU rows on v6e/v7x (2x256); 128-mult for v5e
    return max(8, (tm // 8) * 8)        # sublane multiple for small M


def _vmem_limit_bytes():
    try:
        phys = pltpu.get_tpu_info().vmem_capacity_bytes
    except Exception:
        phys = 64 * 1024 * 1024         # conservative fallback (v7x per-TensorCore)
    # Never request all of physical VMEM (Mosaic needs scratch/spill headroom):
    # ~51 MiB on v7x (64 MiB phys), 100 MiB on v5e/v6e (128 MiB phys).
    return min(int(phys * 0.8), 100 * 1024 * 1024)


def _build_call(M, I, H, tm, out_dtype, act_bytes, single_buffer_params):
    if single_buffer_params:
        # Grid-invariant params: constant index_map (no per-step re-DMA) and a single
        # VMEM buffer (no 2x footprint for the resident weight).
        resident_kwargs = dict(pipeline_mode=pl.Buffered(1))
    else:
        resident_kwargs = {}

    grid = (pl.cdiv(M, tm),)            # ragged last block: reads padded, writes masked

    cost = pl.CostEstimate(
        flops=2 * M * I * H,
        transcendentals=0,
        bytes_accessed=(M * I * act_bytes          # streamed hidden_states
                        + 2 * M * H * act_bytes    # residual in + output
                        + I * H * 2                # bf16 weight
                        + 3 * H * 4),              # bias/gamma/beta
    )

    return pl.pallas_call(
        bert_output_kernel,
        out_shape=jax.ShapeDtypeStruct((M, H), out_dtype),
        grid_spec=pltpu.PrefetchScalarGridSpec(
            num_scalar_prefetch=0,
            grid=grid,
            in_specs=[
                # streamed activation tiles over M (default double-buffered pipeline)
                pl.BlockSpec((tm, I), lambda i: (i, 0)),
                pl.BlockSpec((tm, H), lambda i: (i, 0)),
                # resident parameters (constant block index -> stay in VMEM)
                pl.BlockSpec((I, H), lambda i: (0, 0), **resident_kwargs),
                pl.BlockSpec((1, H), lambda i: (0, 0), **resident_kwargs),
                pl.BlockSpec((1, H), lambda i: (0, 0), **resident_kwargs),
                pl.BlockSpec((1, H), lambda i: (0, 0), **resident_kwargs),
            ],
            out_specs=pl.BlockSpec((tm, H), lambda i: (i, 0)),
        ),
        compiler_params=pltpu.CompilerParams(
            # independent row tiles -> shard across v7x's two TensorCores
            dimension_semantics=("parallel",),
            vmem_limit_bytes=_vmem_limit_bytes(),
        ),
        cost_estimate=cost,
    )


def bert_output(hidden_states, input_tensor, w_t, bias, gamma, beta, *, tm=256):
    """hidden_states: (B,S,I); input_tensor: (B,S,H); w_t: (I,H) = dense.weight.T."""
    B, S, I = hidden_states.shape
    H = input_tensor.shape[-1]
    M = B * S

    h2 = hidden_states.reshape(M, I)
    x2 = input_tensor.reshape(M, H)
    # Feed the MXU bf16 weights (f32 accumulation happens in-kernel). In a real model the
    # parameter would be stored in bf16 already; this cast is a one-time I*H conversion.
    w2 = w_t.astype(jnp.bfloat16)
    b2 = bias.reshape(1, H)
    g2 = gamma.reshape(1, H)
    beta2 = beta.reshape(1, H)

    tm = _choose_tm(M, tm)
    act_bytes = hidden_states.dtype.itemsize
    out_dtype = hidden_states.dtype

    try:
        out = _build_call(M, I, H, tm, out_dtype, act_bytes, True)(
            h2, x2, w2, b2, g2, beta2)
    except Exception:
        # TODO(synk): pipeline_mode=pl.Buffered(1) not supported by this Pallas build;
        # fall back to default (double-buffered) resident parameters.
        out = _build_call(M, I, H, tm, out_dtype, act_bytes, False)(
            h2, x2, w2, b2, g2, beta2)

    return out.reshape(B, S, H)


def reference(hidden_states, input_tensor, w_t, bias, gamma, beta):
    y = jnp.einsum("bsi,ih->bsh", hidden_states, w_t) + bias
    y = y + input_tensor
    mean = jnp.mean(y, axis=-1, keepdims=True)
    var = jnp.mean((y - mean) ** 2, axis=-1, keepdims=True)
    return (y - mean) / jnp.sqrt(var + LN_EPS) * gamma + beta


if __name__ == "__main__":
    # small config: batch=2, seq=8, intermediate_size=64, hidden_size=32
    B, S, I, H = 2, 8, 64, 32

    key = jax.random.PRNGKey(0)
    k1, k2, k3, k4 = jax.random.split(key, 4)

    hidden_states = jax.random.normal(k1, (B, S, I), dtype=jnp.float32)
    input_tensor = jax.random.normal(k2, (B, S, H), dtype=jnp.float32)

    # deterministic parameter init (nn.Linear-like scale), stored as (I, H) = W^T
    w_t = jax.random.normal(k3, (I, H), dtype=jnp.float32) * (1.0 / jnp.sqrt(I))
    bias = jax.random.normal(k4, (H,), dtype=jnp.float32) * 0.02
    gamma = jnp.ones((H,), dtype=jnp.float32)
    beta = jnp.zeros((H,), dtype=jnp.float32)

    out = bert_output(hidden_states, input_tensor, w_t, bias, gamma, beta)
    out = jax.block_until_ready(out)

    ref = reference(hidden_states, input_tensor, w_t, bias, gamma, beta)
    assert out.shape == (B, S, H)
    # bf16 MXU operands (f32 accumulation) -> relaxed tolerance vs. the f32 reference.
    assert jnp.allclose(out, ref, atol=2e-2, rtol=2e-2), "mismatch vs reference"

    print("KERNEL_OK")
</pallas_src>

<mosaic_0001>
module attributes {stable_mosaic.version = 11 : i64} {
  func.func @bert_output_kernel(%arg0: i32, %arg1: memref<16x64xf32, #tpu.memory_space<vmem>>, %arg2: memref<16x32xf32, #tpu.memory_space<vmem>>, %arg3: memref<64x32xbf16, #tpu.memory_space<vmem>>, %arg4: memref<1x32xf32, #tpu.memory_space<vmem>>, %arg5: memref<1x32xf32, #tpu.memory_space<vmem>>, %arg6: memref<1x32xf32, #tpu.memory_space<vmem>>, %arg7: memref<16x32xf32, #tpu.memory_space<vmem>>) attributes {dimension_semantics = [#tpu.dimension_semantics<parallel>], iteration_bounds = array<i64: 1>, scalar_prefetch = 0 : i64, scratch_operands = 0 : i64, tpu.core_type = #tpu.core_type<tc>, window_params = [{transform_indices = @transform_0, window_bounds = array<i64: 16, 64>}, {transform_indices = @transform_1, window_bounds = array<i64: 16, 32>}, {pipeline_mode = #tpu.pipeline_mode<synchronous>, transform_indices = @transform_2, window_bounds = array<i64: 64, 32>}, {pipeline_mode = #tpu.pipeline_mode<synchronous>, transform_indices = @transform_3, window_bounds = array<i64: 1, 32>}, {pipeline_mode = #tpu.pipeline_mode<synchronous>, transform_indices = @transform_4, window_bounds = array<i64: 1, 32>}, {pipeline_mode = #tpu.pipeline_mode<synchronous>, transform_indices = @transform_5, window_bounds = array<i64: 1, 32>}, {transform_indices = @transform_6, window_bounds = array<i64: 16, 32>}]} {
    %c0 = arith.constant 0 : index
    %c0_0 = arith.constant 0 : index
    %0 = vector.load %arg1[%c0, %c0_0] : memref<16x64xf32, #tpu.memory_space<vmem>>, vector<16x64xf32>
    %1 = arith.truncf %0 : vector<16x64xf32> to vector<16x64xbf16>
    %c0_1 = arith.constant 0 : index
    %c0_2 = arith.constant 0 : index
    %2 = vector.load %arg3[%c0_1, %c0_2] : memref<64x32xbf16, #tpu.memory_space<vmem>>, vector<64x32xbf16>
    %cst = arith.constant dense<0.000000e+00> : vector<16x32xf32>
    %3 = tpu.matmul %1, %2, %cst {dimension_numbers = #tpu.dot_dimension_numbers<[1], [0], [0], [1], [0, 0, 1, 1], [], []>} : vector<16x64xbf16>, vector<64x32xbf16>, vector<16x32xf32> -> vector<16x32xf32>
    %c0_3 = arith.constant 0 : index
    %c0_4 = arith.constant 0 : index
    %4 = vector.load %arg4[%c0_3, %c0_4] : memref<1x32xf32, #tpu.memory_space<vmem>>, vector<1x32xf32>
    %5 = vector.broadcast %4 : vector<1x32xf32> to vector<16x32xf32>
    %6 = arith.addf %3, %5 : vector<16x32xf32>
    %c0_5 = arith.constant 0 : index
    %c0_6 = arith.constant 0 : index
    %7 = vector.load %arg2[%c0_5, %c0_6] : memref<16x32xf32, #tpu.memory_space<vmem>>, vector<16x32xf32>
    %8 = arith.addf %6, %7 : vector<16x32xf32>
    %cst_7 = arith.constant dense<0.000000e+00> : vector<16xf32>
    %9 = vector.multi_reduction <add>, %8, %cst_7 [1] : vector<16x32xf32> to vector<16xf32>
    %10 = vector.shape_cast %9 : vector<16xf32> to vector<16x1xf32>
    %cst_8 = arith.constant 3.125000e-02 : f32
    %11 = vector.broadcast %cst_8 : f32 to vector<16x1xf32>
    %12 = arith.mulf %10, %11 : vector<16x1xf32>
    %13 = arith.mulf %8, %8 : vector<16x32xf32>
    %cst_9 = arith.constant dense<0.000000e+00> : vector<16xf32>
    %14 = vector.multi_reduction <add>, %13, %cst_9 [1] : vector<16x32xf32> to vector<16xf32>
    %15 = vector.shape_cast %14 : vector<16xf32> to vector<16x1xf32>
    %cst_10 = arith.constant 3.125000e-02 : f32
    %16 = vector.broadcast %cst_10 : f32 to vector<16x1xf32>
    %17 = arith.mulf %15, %16 : vector<16x1xf32>
    %18 = arith.mulf %12, %12 : vector<16x1xf32>
    %19 = arith.subf %17, %18 : vector<16x1xf32>
    %cst_11 = arith.constant 0.000000e+00 : f32
    %20 = vector.broadcast %cst_11 : f32 to vector<16x1xf32>
    %21 = arith.maximumf %19, %20 : vector<16x1xf32>
    %cst_12 = arith.constant 9.99999996E-13 : f32
    %22 = vector.broadcast %cst_12 : f32 to vector<16x1xf32>
    %23 = arith.addf %21, %22 : vector<16x1xf32>
    %24 = math.rsqrt %23 : vector<16x1xf32>
    %25 = vector.broadcast %12 : vector<16x1xf32> to vector<16x32xf32>
    %26 = arith.subf %8, %25 : vector<16x32xf32>
    %27 = vector.broadcast %24 : vector<16x1xf32> to vector<16x32xf32>
    %28 = arith.mulf %26, %27 : vector<16x32xf32>
    %c0_13 = arith.constant 0 : index
    %c0_14 = arith.constant 0 : index
    %29 = vector.load %arg5[%c0_13, %c0_14] : memref<1x32xf32, #tpu.memory_space<vmem>>, vector<1x32xf32>
    %30 = vector.broadcast %29 : vector<1x32xf32> to vector<16x32xf32>
    %31 = arith.mulf %28, %30 : vector<16x32xf32>
    %c0_15 = arith.constant 0 : index
    %c0_16 = arith.constant 0 : index
    %32 = vector.load %arg6[%c0_15, %c0_16] : memref<1x32xf32, #tpu.memory_space<vmem>>, vector<1x32xf32>
    %33 = vector.broadcast %32 : vector<1x32xf32> to vector<16x32xf32>
    %34 = arith.addf %31, %33 : vector<16x32xf32>
    %c0_17 = arith.constant 0 : index
    %c0_18 = arith.constant 0 : index
    %35 = vector.load %arg7[%c0_17, %c0_18] : memref<16x32xf32, #tpu.memory_space<vmem>>, vector<16x32xf32>
    tpu.vector_store %arg7[%c0_17, %c0_18], %34 {strides = array<i32>} : memref<16x32xf32, #tpu.memory_space<vmem>>, vector<16x32xf32>,
    return
  }
  func.func @transform_0(%arg0: i32) -> (i32, i32) {
    %c0_i32 = arith.constant 0 : i32
    %c0_i32_0 = arith.constant 0 : i32
    return %arg0, %c0_i32 : i32, i32
  }
  func.func @transform_1(%arg0: i32) -> (i32, i32) {
    %c0_i32 = arith.constant 0 : i32
    %c0_i32_0 = arith.constant 0 : i32
    return %arg0, %c0_i32 : i32, i32
  }
  func.func @transform_2(%arg0: i32) -> (i32, i32) {
    %c0_i32 = arith.constant 0 : i32
    %c0_i32_0 = arith.constant 0 : i32
    %c0_i32_1 = arith.constant 0 : i32
    return %c0_i32, %c0_i32_0 : i32, i32
  }
  func.func @transform_3(%arg0: i32) -> (i32, i32) {
    %c0_i32 = arith.constant 0 : i32
    %c0_i32_0 = arith.constant 0 : i32
    %c0_i32_1 = arith.constant 0 : i32
    return %c0_i32, %c0_i32_0 : i32, i32
  }
  func.func @transform_4(%arg0: i32) -> (i32, i32) {
    %c0_i32 = arith.constant 0 : i32
    %c0_i32_0 = arith.constant 0 : i32
    %c0_i32_1 = arith.constant 0 : i32
    return %c0_i32, %c0_i32_0 : i32, i32
  }
  func.func @transform_5(%arg0: i32) -> (i32, i32) {
    %c0_i32 = arith.constant 0 : i32
    %c0_i32_0 = arith.constant 0 : i32
    %c0_i32_1 = arith.constant 0 : i32
    return %c0_i32, %c0_i32_0 : i32, i32
  }
  func.func @transform_6(%arg0: i32) -> (i32, i32) {
    %c0_i32 = arith.constant 0 : i32
    %c0_i32_0 = arith.constant 0 : i32
    return %arg0, %c0_i32 : i32, i32
  }
}

module attributes {stable_mosaic.version = 11 : i64} {
  func.func @bert_output_kernel(%arg0: i32, %arg1: memref<16x64xf32, #tpu.memory_space<vmem>>, %arg2: memref<16x32xf32, #tpu.memory_space<vmem>>, %arg3: memref<64x32xbf16, #tpu.memory_space<vmem>>, %arg4: memref<1x32xf32, #tpu.memory_space<vmem>>, %arg5: memref<1x32xf32, #tpu.memory_space<vmem>>, %arg6: memref<1x32xf32, #tpu.memory_space<vmem>>, %arg7: memref<16x32xf32, #tpu.memory_space<vmem>>) attributes {dimension_semantics = [#tpu.dimension_semantics<parallel>], iteration_bounds = array<i64: 1>, scalar_prefetch = 0 : i64, scratch_operands = 0 : i64, tpu.core_type = #tpu.core_type<tc>, window_params = [{transform_indices = @transform_0, window_bounds = array<i64: 16, 64>}, {transform_indices = @transform_1, window_bounds = array<i64: 16, 32>}, {pipeline_mode = #tpu.pipeline_mode<synchronous>, transform_indices = @transform_2, window_bounds = array<i64: 64, 32>}, {pipeline_mode = #tpu.pipeline_mode<synchronous>, transform_indices = @transform_3, window_bounds = array<i64: 1, 32>}, {pipeline_mode = #tpu.pipeline_mode<synchronous>, transform_indices = @transform_4, window_bounds = array<i64: 1, 32>}, {pipeline_mode = #tpu.pipeline_mode<synchronous>, transform_indices = @transform_5, window_bounds = array<i64: 1, 32>}, {transform_indices = @transform_6, window_bounds = array<i64: 16, 32>}]} {
    %c0 = arith.constant 0 : index
    %c0_0 = arith.constant 0 : index
    %0 = vector.load %arg1[%c0, %c0_0] : memref<16x64xf32, #tpu.memory_space<vmem>>, vector<16x64xf32>
    %1 = arith.truncf %0 : vector<16x64xf32> to vector<16x64xbf16>
    %c0_1 = arith.constant 0 : index
    %c0_2 = arith.constant 0 : index
    %2 = vector.load %arg3[%c0_1, %c0_2] : memref<64x32xbf16, #tpu.memory_space<vmem>>, vector<64x32xbf16>
    %cst = arith.constant dense<0.000000e+00> : vector<16x32xf32>
    %3 = tpu.matmul %1, %2, %cst {dimension_numbers = #tpu.dot_dimension_numbers<[1], [0], [0], [1], [0, 0, 1, 1], [], []>} : vector<16x64xbf16>, vector<64x32xbf16>, vector<16x32xf32> -> vector<16x32xf32>
    %c0_3 = arith.constant 0 : index
    %c0_4 = arith.constant 0 : index
    %4 = vector.load %arg4[%c0_3, %c0_4] : memref<1x32xf32, #tpu.memory_space<vmem>>, vector<1x32xf32>
    %5 = vector.broadcast %4 : vector<1x32xf32> to vector<16x32xf32>
    %6 = arith.addf %3, %5 : vector<16x32xf32>
    %c0_5 = arith.constant 0 : index
    %c0_6 = arith.constant 0 : index
    %7 = vector.load %arg2[%c0_5, %c0_6] : memref<16x32xf32, #tpu.memory_space<vmem>>, vector<16x32xf32>
    %8 = arith.addf %6, %7 : vector<16x32xf32>
    %cst_7 = arith.constant dense<0.000000e+00> : vector<16xf32>
    %9 = vector.multi_reduction <add>, %8, %cst_7 [1] : vector<16x32xf32> to vector<16xf32>
    %10 = vector.shape_cast %9 : vector<16xf32> to vector<16x1xf32>
    %cst_8 = arith.constant 3.125000e-02 : f32
    %11 = vector.broadcast %cst_8 : f32 to vector<16x1xf32>
    %12 = arith.mulf %10, %11 : vector<16x1xf32>
    %13 = arith.mulf %8, %8 : vector<16x32xf32>
    %cst_9 = arith.constant dense<0.000000e+00> : vector<16xf32>
    %14 = vector.multi_reduction <add>, %13, %cst_9 [1] : vector<16x32xf32> to vector<16xf32>
    %15 = vector.shape_cast %14 : vector<16xf32> to vector<16x1xf32>
    %cst_10 = arith.constant 3.125000e-02 : f32
    %16 = vector.broadcast %cst_10 : f32 to vector<16x1xf32>
    %17 = arith.mulf %15, %16 : vector<16x1xf32>
    %18 = arith.mulf %12, %12 : vector<16x1xf32>
    %19 = arith.subf %17, %18 : vector<16x1xf32>
    %cst_11 = arith.constant 0.000000e+00 : f32
    %20 = vector.broadcast %cst_11 : f32 to vector<16x1xf32>
    %21 = arith.maximumf %19, %20 : vector<16x1xf32>
    %cst_12 = arith.constant 9.99999996E-13 : f32
    %22 = vector.broadcast %cst_12 : f32 to vector<16x1xf32>
    %23 = arith.addf %21, %22 : vector<16x1xf32>
    %24 = math.rsqrt %23 : vector<16x1xf32>
    %25 = vector.broadcast %12 : vector<16x1xf32> to vector<16x32xf32>
    %26 = arith.subf %8, %25 : vector<16x32xf32>
    %27 = vector.broadcast %24 : vector<16x1xf32> to vector<16x32xf32>
    %28 = arith.mulf %26, %27 : vector<16x32xf32>
    %c0_13 = arith.constant 0 : index
    %c0_14 = arith.constant 0 : index
    %29 = vector.load %arg5[%c0_13, %c0_14] : memref<1x32xf32, #tpu.memory_space<vmem>>, vector<1x32xf32>
    %30 = vector.broadcast %29 : vector<1x32xf32> to vector<16x32xf32>
    %31 = arith.mulf %28, %30 : vector<16x32xf32>
    %c0_15 = arith.constant 0 : index
    %c0_16 = arith.constant 0 : index
    %32 = vector.load %arg6[%c0_15, %c0_16] : memref<1x32xf32, #tpu.memory_space<vmem>>, vector<1x32xf32>
    %33 = vector.broadcast %32 : vector<1x32xf32> to vector<16x32xf32>
    %34 = arith.addf %31, %33 : vector<16x32xf32>
    %c0_17 = arith.constant 0 : index
    %c0_18 = arith.constant 0 : index
    %35 = vector.load %arg7[%c0_17, %c0_18] : memref<16x32xf32, #tpu.memory_space<vmem>>, vector<16x32xf32>
    tpu.vector_store %arg7[%c0_17, %c0_18], %34 {strides = array<i32>} : memref<16x32xf32, #tpu.memory_space<vmem>>, vector<16x32xf32>,
    return
  }
  func.func @transform_0(%arg0: i32) -> (i32, i32) {
    %c0_i32 = arith.constant 0 : i32
    %c0_i32_0 = arith.constant 0 : i32
    return %arg0, %c0_i32 : i32, i32
  }
  func.func @transform_1(%arg0: i32) -> (i32, i32) {
    %c0_i32 = arith.constant 0 : i32
    %c0_i32_0 = arith.constant 0 : i32
    return %arg0, %c0_i32 : i32, i32
  }
  func.func @transform_2(%arg0: i32) -> (i32, i32) {
    %c0_i32 = arith.constant 0 : i32
    %c0_i32_0 = arith.constant 0 : i32
    %c0_i32_1 = arith.constant 0 : i32
    return %c0_i32, %c0_i32_0 : i32, i32
  }
  func.func @transform_3(%arg0: i32) -> (i32, i32) {
    %c0_i32 = arith.constant 0 : i32
    %c0_i32_0 = arith.constant 0 : i32
    %c0_i32_1 = arith.constant 0 : i32
    return %c0_i32, %c0_i32_0 : i32, i32
  }
  func.func @transform_4(%arg0: i32) -> (i32, i32) {
    %c0_i32 = arith.constant 0 : i32
    %c0_i32_0 = arith.constant 0 : i32
    %c0_i32_1 = arith.constant 0 : i32
    return %c0_i32, %c0_i32_0 : i32, i32
  }
  func.func @transform_5(%arg0: i32) -> (i32, i32) {
    %c0_i32 = arith.constant 0 : i32
    %c0_i32_0 = arith.constant 0 : i32
    %c0_i32_1 = arith.constant 0 : i32
    return %c0_i32, %c0_i32_0 : i32, i32
  }
  func.func @transform_6(%arg0: i32) -> (i32, i32) {
    %c0_i32 = arith.constant 0 : i32
    %c0_i32_0 = arith.constant 0 : i32
    return %arg0, %c0_i32 : i32, i32
  }
}

</mosaic_0001>

<bundles_post_ra>
// kernel: tpu_custom_call.1
= control target key start
LH: loop header
LB: loop body
LE: loop exit
PB: predicated region body
PF: predicated region fallthrough
CT: control target
= control target key end

     0   :  { %v247_v1 = vmov 0.0   ;;  %vm248_vm0 = vmmov 0   ;;  %s338_s0 = inlined_call_operand.vmem [shape: f32[16,64], index: 0, kind: input, shape index: {}]   ;;  %s339_s1 = inlined_call_operand.vmem [shape: f32[16,32], index: 1, kind: input, shape index: {}]   ;;  %s340_s2 = inlined_call_operand.vmem [shape: bf16[64,32], index: 2, kind: input, shape index: {}]   ;;  %s341_s3 = inlined_call_operand.vmem [shape: f32[1,32], index: 3, kind: input, shape index: {}]   ;;  %s342_s4 = inlined_call_operand.vmem [shape: f32[1,32], index: 4, kind: input, shape index: {}]   ;;  %s343_s5 = inlined_call_operand.vmem [shape: f32[1,32], index: 5, kind: input, shape index: {}]   ;;  %s344_s6 = inlined_call_operand.hbm [shape: f32[16,32], index: 6, kind: output, shape index: {}]  }
   0x1   :  { %v215_v0 = vld [vmem:[%s340_s2] sm:$0xff]   ;;  %198 = vmatprep.subr.bf16.mxu0 %v247_v1  ;;  %v216_v2 = vld [vmem:[%s340_s2 + $0x8] sm:$0xff]   ;;  %206 = vmatprep.mubr.msk.bf16.mxu0 %vm248_vm0, %v247_v1 }
   0x2   :  { %199 = vmatpush3.bf16.msra.mxu0 %v215_v0 }
   0x3   :  { %200 = vmatprep.subr.bf16.mxu0 %v247_v1 }
   0x4   :  { %11 = vsyncpa [#allocation3], 0  ;;  %v217_v3 = vld [vmem:[%s340_s2 + $0x10] sm:$0xff]   ;;  %v218_v4 = vld [vmem:[%s340_s2 + $0x18] sm:$0xff]   ;;  %vm67_vm1 = vcmask 523264   ;;  %vm116_vm2 = vcmask 261120  }
   0x5   :  { %v25_v5 = vld [vmem:[%s338_s0] sm:$0xff]  ;;  %v26_v6 = vld [vmem:[%s338_s0 + $0x8] sm:$0xff]  ;;  %s249_s15 = smov [#allocation2]  }
   0x6   :  { %201 = vmatpush3.bf16.msra.mxu0 %v216_v2  ;;  %v27_v7 = vpack.c.bf16 %v26_v6, %v25_v5  ;;  %v185_v8 = vld [vmem:[%s341_s3] ss:$0 sm:$0xff]  ;;  %v113_v14 = vld [vmem:[%s339_s1 + $0x8] sm:$0xff]  ;;  %s174_s16 = sshll.u32 %s249_s15, 4  ;;  %s175_s16 = int_to_ptr.vmem [resolvable:$true] %s174_s16 }
   0x7   :  { %202 = vmatprep.subr.bf16.mxu0 %v247_v1  ;;  %v112_v10 = vld [vmem:[%s339_s1] sm:$0xff]  ;;  %p228_p1 = scmp.lt.s32.totalorder %s175_s16, %s175_s16 }
   0x8   :  { %v191_v43 = vld [vmem:[%s342_s4] ss:$0 sm:$0xff]  ;;  %s223_s4 = scalar_lea.vmem %s175_s16, 256 }
   0x9   :  { %v192_v45 = vld [vmem:[%s343_s5] ss:$0 sm:$0xff]  ;;  %p224_p0 = scmp.ne.s32.totalorder %s175_s16, %s223_s4  ;;  %p229_p2 = scmp.lt.s32.totalorder %s223_s4, %s223_s4 }
   0xa   :  { %203 = vmatpush3.bf16.msra.mxu0 %v217_v3 }
   0xb   :  { %204 = vmatprep.subr.bf16.mxu0 %v247_v1  ;;  %p230_p3 = por %p229_p2, %p228_p1 }
   0xd   :  { %p231_p4 = pnand %p230_p3, %p224_p0 }
   0xe   :  { %205 = vmatpush3.bf16.msra.mxu0 %v218_v4 }
  0x11   :  { %207 = vmatmul.mubr.msk.bf16.vlgmr.msra.gmra.mrb[0].mxu0 %vm67_vm1, %v27_v7 }
  0xe4   :  { %v105_v9 = vpop.f32.mrb[0].mxu0 }
  0xe5   :  { %v106_v11 = vadd.f32 %v185_v8, %v105_v9  ;;  %v208_v12 = vpop.f32.mrb[1].mxu0 }
  0xe6   :  { %v108_v13 = vpop.f32.mrb[2].mxu0 }
  0xe7   :  { %v114_v15 = vadd.f32 %v112_v10, %v106_v11  ;;  %v109_v16 = vadd.f32 %v185_v8, %v108_v13  ;;  %v209_v17 = vpop.f32.mrb[3].mxu0 }
  0xe9   :  { %v115_v18 = vadd.f32 %v113_v14, %v109_v16  ;;  %v117_v19 = vsel %vm116_vm2, %v114_v15, 0.0  ;;  %v125_v20 = vmul.f32 %v114_v15, %v114_v15 }
  0xea   :  { %118 = vadd.xlane.f32.xlu0 %v117_v19 }
  0xeb   :  { %v127_v21 = vsel %vm116_vm2, %v125_v20, 0.0  ;;  %v126_v22 = vmul.f32 %v115_v18, %v115_v18  ;;  %v120_v23 = vsel %vm116_vm2, %v115_v18, 0.0 }
  0xec   :  { %128 = vadd.xlane.f32.xlu1 %v127_v21 }
  0xed   :  { %v130_v24 = vsel %vm116_vm2, %v126_v22, 0.0 }
  0xee   :  { %121 = vadd.xlane.f32.xlu0 %v120_v23 }
  0xf0   :  { %131 = vadd.xlane.f32.xlu1 %v130_v24 }
 0x177   :  { %v119_v25 = vpop.xlane.xlu0 %118 }
 0x178   :  { %v123_v26 = vmul.f32 0.03125, %v119_v25 }
 0x179   :  { %v129_v27 = vpop.xlane.xlu1 %128 }
 0x17a   :  { %v135_v28 = vmul.f32 %v123_v26, %v123_v26  ;;  %v133_v29 = vmul.f32 0.03125, %v129_v27  ;;  %v145_v41 = vsub.f32 %v114_v15, %v123_v26 }
 0x17b   :  { %v122_v30 = vpop.xlane.xlu0 %121 }
 0x17c   :  { %v137_v31 = vsub.f32 %v133_v29, %v135_v28  ;;  %v124_v32 = vmul.f32 0.03125, %v122_v30 }
 0x17d   :  { %v132_v33 = vpop.xlane.xlu1 %131 }
 0x17e   :  { %v139_v34 = vmax.f32 %v137_v31, 0.0  ;;  %v136_v35 = vmul.f32 %v124_v32, %v124_v32  ;;  %v134_v36 = vmul.f32 0.03125, %v132_v33  ;;  %v146_v46 = vsub.f32 %v115_v18, %v124_v32 }
 0x180   :  { %v141_v37 = vadd.f32 1e-12, %v139_v34  ;;  %v138_v38 = vsub.f32 %v134_v36, %v136_v35 }
 0x182   :  { %219 = vrsqrt.f32 %v141_v37  ;;  %v140_v39 = vmax.f32 %v138_v38, 0.0 }
 0x184   :  { %v142_v40 = vadd.f32 1e-12, %v140_v39 }
 0x186   :  { %221 = vrsqrt.f32 %v142_v40 }
 0x18c   :  { %v220_v42 = vpop.eup %219 }
 0x18d   :  { %v147_v44 = vmul.f32 %v220_v42, %v145_v41 }
 0x18f   :  { %v156_v47 = vmul.f32 %v191_v43, %v147_v44 }
 0x190   :  { %v222_v48 = vpop.eup %221 }
 0x191   :  { %v148_v49 = vmul.f32 %v222_v48, %v146_v46  ;;  %v165_v50 = vadd.f32 %v192_v45, %v156_v47 }
 0x193   :  { %v157_v51 = vmul.f32 %v191_v43, %v148_v49  ;;  %167 = vst.msk [vmem:[#allocation2] sm:$0xff] %vm116_vm2, %v165_v50 }
 0x195   :  { %v166_v52 = vadd.f32 %v192_v45, %v157_v51 }
 0x197   :  { %168 = vst.msk [vmem:[#allocation2 + $0x8] sm:$0xff] %vm116_vm2, %v166_v52 }
 0x198   :  { %234 = shalt.err (!%p231_p4)
}
 0x199   :  { %s235_s18 = scalar_lea.hbm %s344_s6, 256 }
 0x19a   :  { %p236_p5 = scmp.ne.s32.totalorder %s344_s6, %s235_s18  ;;  %p239_p6 = scmp.lt.u32.totalorder %s235_s18, %s344_s6 }
 0x19c   :  { %p241_p7 = pnand %p239_p6, %p236_p5 }
 0x19e   :  { %244 = shalt.err (!%p241_p7)
}
 0x19f   :  { %s250_s23 = smov 128   ;;  %s251_s24 = smov 8  }
 0x1a0   :  { %180 = dma.vmem_to_hbm [thread:$0]  %s175_s16, 256, %s344_s6, [#allocation3], %s250_s23, %s250_s23, %s251_s24  }
 0x1a1   :  { %245 = dma.done.wait [#allocation3], 256  }
 0x1a2   :  { %246 = vsyncadd [#allocation3], 4294967040 }
 0x1a3   :  { %184 = vsyncpa [#allocation3], 1 }

// kernel: tpu_custom_call.1
= control target key start
LH: loop header
LB: loop body
LE: loop exit
PB: predicated region body
PF: predicated region fallthrough
CT: control target
= control target key end

     0   :  { %v247_v1 = vmov 0.0   ;;  %vm248_vm0 = vmmov 0   ;;  %s338_s0 = inlined_call_operand.vmem [shape: f32[16,64], index: 0, kind: input, shape index: {}]   ;;  %s339_s1 = inlined_call_operand.vmem [shape: f32[16,32], index: 1, kind: input, shape index: {}]   ;;  %s340_s2 = inlined_call_operand.vmem [shape: bf16[64,32], index: 2, kind: input, shape index: {}]   ;;  %s341_s3 = inlined_call_operand.vmem [shape: f32[1,32], index: 3, kind: input, shape index: {}]   ;;  %s342_s4 = inlined_call_operand.vmem [shape: f32[1,32], index: 4, kind: input, shape index: {}]   ;;  %s343_s5 = inlined_call_operand.vmem [shape: f32[1,32], index: 5, kind: input, shape index: {}]   ;;  %s344_s6 = inlined_call_operand.hbm [shape: f32[16,32], index: 6, kind: output, shape index: {}]  }
   0x1   :  { %v215_v0 = vld [vmem:[%s340_s2] sm:$0xff]   ;;  %198 = vmatprep.subr.bf16.mxu0 %v247_v1  ;;  %v216_v2 = vld [vmem:[%s340_s2 + $0x8] sm:$0xff]   ;;  %206 = vmatprep.mubr.msk.bf16.mxu0 %vm248_vm0, %v247_v1 }
   0x2   :  { %199 = vmatpush3.bf16.msra.mxu0 %v215_v0 }
   0x3   :  { %200 = vmatprep.subr.bf16.mxu0 %v247_v1 }
   0x4   :  { %11 = vsyncpa [#allocation3], 0  ;;  %v217_v3 = vld [vmem:[%s340_s2 + $0x10] sm:$0xff]   ;;  %v218_v4 = vld [vmem:[%s340_s2 + $0x18] sm:$0xff]   ;;  %vm67_vm1 = vcmask 523264   ;;  %vm116_vm2 = vcmask 261120  }
   0x5   :  { %v25_v5 = vld [vmem:[%s338_s0] sm:$0xff]  ;;  %v26_v6 = vld [vmem:[%s338_s0 + $0x8] sm:$0xff]  ;;  %s249_s15 = smov [#allocation2]  }
   0x6   :  { %201 = vmatpush3.bf16.msra.mxu0 %v216_v2  ;;  %v27_v7 = vpack.c.bf16 %v26_v6, %v25_v5  ;;  %v185_v8 = vld [vmem:[%s341_s3] ss:$0 sm:$0xff]  ;;  %v113_v14 = vld [vmem:[%s339_s1 + $0x8] sm:$0xff]  ;;  %s174_s16 = sshll.u32 %s249_s15, 4  ;;  %s175_s16 = int_to_ptr.vmem [resolvable:$true] %s174_s16 }
   0x7   :  { %202 = vmatprep.subr.bf16.mxu0 %v247_v1  ;;  %v112_v10 = vld [vmem:[%s339_s1] sm:$0xff]  ;;  %p228_p1 = scmp.lt.s32.totalorder %s175_s16, %s175_s16 }
   0x8   :  { %v191_v43 = vld [vmem:[%s342_s4] ss:$0 sm:$0xff]  ;;  %s223_s4 = scalar_lea.vmem %s175_s16, 256 }
   0x9   :  { %v192_v45 = vld [vmem:[%s343_s5] ss:$0 sm:$0xff]  ;;  %p224_p0 = scmp.ne.s32.totalorder %s175_s16, %s223_s4  ;;  %p229_p2 = scmp.lt.s32.totalorder %s223_s4, %s223_s4 }
   0xa   :  { %203 = vmatpush3.bf16.msra.mxu0 %v217_v3 }
   0xb   :  { %204 = vmatprep.subr.bf16.mxu0 %v247_v1  ;;  %p230_p3 = por %p229_p2, %p228_p1 }
   0xd   :  { %p231_p4 = pnand %p230_p3, %p224_p0 }
   0xe   :  { %205 = vmatpush3.bf16.msra.mxu0 %v218_v4 }
  0x11   :  { %207 = vmatmul.mubr.msk.bf16.vlgmr.msra.gmra.mrb[0].mxu0 %vm67_vm1, %v27_v7 }
  0xe4   :  { %v105_v9 = vpop.f32.mrb[0].mxu0 }
  0xe5   :  { %v106_v11 = vadd.f32 %v185_v8, %v105_v9  ;;  %v208_v12 = vpop.f32.mrb[1].mxu0 }
  0xe6   :  { %v108_v13 = vpop.f32.mrb[2].mxu0 }
  0xe7   :  { %v114_v15 = vadd.f32 %v112_v10, %v106_v11  ;;  %v109_v16 = vadd.f32 %v185_v8, %v108_v13  ;;  %v209_v17 = vpop.f32.mrb[3].mxu0 }
  0xe9   :  { %v115_v18 = vadd.f32 %v113_v14, %v109_v16  ;;  %v117_v19 = vsel %vm116_vm2, %v114_v15, 0.0  ;;  %v125_v20 = vmul.f32 %v114_v15, %v114_v15 }
  0xea   :  { %118 = vadd.xlane.f32.xlu0 %v117_v19 }
  0xeb   :  { %v127_v21 = vsel %vm116_vm2, %v125_v20, 0.0  ;;  %v126_v22 = vmul.f32 %v115_v18, %v115_v18  ;;  %v120_v23 = vsel %vm116_vm2, %v115_v18, 0.0 }
  0xec   :  { %128 = vadd.xlane.f32.xlu1 %v127_v21 }
  0xed   :  { %v130_v24 = vsel %vm116_vm2, %v126_v22, 0.0 }
  0xee   :  { %121 = vadd.xlane.f32.xlu0 %v120_v23 }
  0xf0   :  { %131 = vadd.xlane.f32.xlu1 %v130_v24 }
 0x177   :  { %v119_v25 = vpop.xlane.xlu0 %118 }
 0x178   :  { %v123_v26 = vmul.f32 0.03125, %v119_v25 }
 0x179   :  { %v129_v27 = vpop.xlane.xlu1 %128 }
 0x17a   :  { %v135_v28 = vmul.f32 %v123_v26, %v123_v26  ;;  %v133_v29 = vmul.f32 0.03125, %v129_v27  ;;  %v145_v41 = vsub.f32 %v114_v15, %v123_v26 }
 0x17b   :  { %v122_v30 = vpop.xlane.xlu0 %121 }
 0x17c   :  { %v137_v31 = vsub.f32 %v133_v29, %v135_v28  ;;  %v124_v32 = vmul.f32 0.03125, %v122_v30 }
 0x17d   :  { %v132_v33 = vpop.xlane.xlu1 %131 }
 0x17e   :  { %v139_v34 = vmax.f32 %v137_v31, 0.0  ;;  %v136_v35 = vmul.f32 %v124_v32, %v124_v32  ;;  %v134_v36 = vmul.f32 0.03125, %v132_v33  ;;  %v146_v46 = vsub.f32 %v115_v18, %v124_v32 }
 0x180   :  { %v141_v37 = vadd.f32 1e-12, %v139_v34  ;;  %v138_v38 = vsub.f32 %v134_v36, %v136_v35 }
 0x182   :  { %219 = vrsqrt.f32 %v141_v37  ;;  %v140_v39 = vmax.f32 %v138_v38, 0.0 }
 0x184   :  { %v142_v40 = vadd.f32 1e-12, %v140_v39 }
 0x186   :  { %221 = vrsqrt.f32 %v142_v40 }
 0x18c   :  { %v220_v42 = vpop.eup %219 }
 0x18d   :  { %v147_v44 = vmul.f32 %v220_v42, %v145_v41 }
 0x18f   :  { %v156_v47 = vmul.f32 %v191_v43, %v147_v44 }
 0x190   :  { %v222_v48 = vpop.eup %221 }
 0x191   :  { %v148_v49 = vmul.f32 %v222_v48, %v146_v46  ;;  %v165_v50 = vadd.f32 %v192_v45, %v156_v47 }
 0x193   :  { %v157_v51 = vmul.f32 %v191_v43, %v148_v49  ;;  %167 = vst.msk [vmem:[#allocation2] sm:$0xff] %vm116_vm2, %v165_v50 }
 0x195   :  { %v166_v52 = vadd.f32 %v192_v45, %v157_v51 }
 0x197   :  { %168 = vst.msk [vmem:[#allocation2 + $0x8] sm:$0xff] %vm116_vm2, %v166_v52 }
 0x198   :  { %234 = shalt.err (!%p231_p4)
}
 0x199   :  { %s235_s18 = scalar_lea.hbm %s344_s6, 256 }
 0x19a   :  { %p236_p5 = scmp.ne.s32.totalorder %s344_s6, %s235_s18  ;;  %p239_p6 = scmp.lt.u32.totalorder %s235_s18, %s344_s6 }
 0x19c   :  { %p241_p7 = pnand %p239_p6, %p236_p5 }
 0x19e   :  { %244 = shalt.err (!%p241_p7)
}
 0x19f   :  { %s250_s23 = smov 128   ;;  %s251_s24 = smov 8  }
 0x1a0   :  { %180 = dma.vmem_to_hbm [thread:$0]  %s175_s16, 256, %s344_s6, [#allocation3], %s250_s23, %s250_s23, %s251_s24  }
 0x1a1   :  { %245 = dma.done.wait [#allocation3], 256  }
 0x1a2   :  { %246 = vsyncadd [#allocation3], 4294967040 }
 0x1a3   :  { %184 = vsyncpa [#allocation3], 1 }

</bundles_post_ra>
